<compile_context>
chip_gen: v7x
topology: tpu7x:2x2x1
jax: 0.10.0
libtpu: 0.0.40
codegen_flags: <defaults>
</compile_context>

<pallas_src>
import jax
import jax.numpy as jnp
from jax.experimental import pallas as pl
from jax.experimental.pallas import tpu as pltpu


def _round_up(x, m):
    return (x + m - 1) // m * m


# ---------------------------------------------------------------------------
# Pallas kernel 1: STFT as a row-tiled matmul  frames @ [win*cos | -win*sin]/wnorm
# ---------------------------------------------------------------------------
def _stft_matmul_kernel(frames_ref, dft_ref, out_ref):
    out_ref[...] = jnp.dot(frames_ref[...], dft_ref[...],
                           preferred_element_type=jnp.float32)


def pallas_stft_matmul(frames, dft):
    """frames: (R, K) f32, dft: (K, N) f32 -> (R, N) f32."""
    R, K = frames.shape
    N = dft.shape[1]
    # >=2 "parallel" grid steps whenever R >= 16 (v7x has 2 TensorCores);
    # tile grows to 512 rows for long audio (memory-bound roofline).
    row_tile = int(min(512, _round_up(max(R // 2, 8), 8)))
    R_pad = _round_up(R, row_tile)
    N_pad = _round_up(N, 128)                 # lane-dense stores
    frames_p = jnp.pad(frames.astype(jnp.float32), ((0, R_pad - R), (0, 0)))
    dft_p = jnp.pad(dft.astype(jnp.float32), ((0, 0), (0, N_pad - N)))

    out = pl.pallas_call(
        _stft_matmul_kernel,
        out_shape=jax.ShapeDtypeStruct((R_pad, N_pad), jnp.float32),
        grid_spec=pltpu.PrefetchScalarGridSpec(
            num_scalar_prefetch=0,
            grid=(R_pad // row_tile,),
            in_specs=[pl.BlockSpec((row_tile, K), lambda r: (r, 0)),
                      pl.BlockSpec((K, N_pad), lambda r: (0, 0))],
            out_specs=pl.BlockSpec((row_tile, N_pad), lambda r: (r, 0)),
        ),
        compiler_params=pltpu.CompilerParams(
            dimension_semantics=("parallel",)),
    )(frames_p, dft_p)
    return out[:R, :N]


# ---------------------------------------------------------------------------
# Pallas kernel 2: dilated 2D conv (stride 1, torch-'same' padding) + bias
#                  + optional fused leaky_relu(0.2), after wrapper-side
#                  kw-im2col.  One grid step per batch element; kh unrolled
#                  MXU dots with M = H*Wp, K = kw*Cin, N = Cout_pad (=128k).
# ---------------------------------------------------------------------------
def _make_conv_kernel(kh, row_stride, m, apply_lrelu):
    def kernel(x_ref, w_ref, b_ref, o_ref):
        # The f32 VMEM output block doubles as the accumulator; init with the
        # first tap's dot (no zero-fill + add).
        o_ref[0] = jnp.dot(x_ref[0, pl.ds(0, m), :], w_ref[0],
                           preferred_element_type=jnp.float32)
        for t in range(1, kh):                 # unrolled kh-tap reduction
            start = t * row_stride             # static, multiple of 8 (Wp % 8 == 0)
            o_ref[0] += jnp.dot(x_ref[0, pl.ds(start, m), :], w_ref[t],
                                preferred_element_type=jnp.float32)
        y = o_ref[0] + b_ref[...]              # bias in f32
        if apply_lrelu:
            y = jnp.where(y >= 0.0, y, 0.2 * y)
        o_ref[0] = y                           # full lane-dense (m, 128) slab store
    return kernel


def conv2d_pallas(x, w, b, dilation, apply_lrelu):
    """x: (B,H,W,Cin) NHWC; w: (kh,kw,Cin,Cout) HWIO f32; b: (Cout,) f32.
    Stride 1, padding ((kh-1)*dh//2, (kw-1)*dw//2) (same as make_pad). NHWC f32 out."""
    B, H, W, Cin = x.shape
    kh, kw, _, Cout = w.shape
    dh, dw = dilation
    # Even effective kernels would silently break the 'same' padding math.
    assert (kh - 1) * dh % 2 == 0 and (kw - 1) * dw % 2 == 0
    ph = (kh - 1) * dh // 2
    pw = (kw - 1) * dw // 2

    # kw-im2col in the wrapper: (B, H+2ph, W, kw*Cin), bf16.
    xw = jnp.pad(x.astype(jnp.bfloat16), ((0, 0), (ph, ph), (pw, pw), (0, 0)))
    xc = jnp.concatenate(
        [xw[:, :, tw * dw: tw * dw + W, :] for tw in range(kw)], axis=-1)
    Wp = _round_up(W, 8)                       # flat rows of width Wp (sublane-exact)
    Kc = kw * Cin
    Hp = H + 2 * ph
    xc = jnp.pad(xc, ((0, 0), (0, 0), (0, Wp - W), (0, 0))).reshape(B, Hp * Wp, Kc)

    Cout_pad = _round_up(Cout, 128)            # lane-dense output slab
    wf = jnp.pad(w.reshape(kh, Kc, Cout).astype(jnp.bfloat16),
                 ((0, 0), (0, 0), (0, Cout_pad - Cout)))
    bf = jnp.pad(b.astype(jnp.float32)[None, :], ((0, 0), (0, Cout_pad - Cout)))

    m = H * Wp
    kernel = _make_conv_kernel(kh, dh * Wp, m, apply_lrelu)
    out = pl.pallas_call(
        kernel,
        out_shape=jax.ShapeDtypeStruct((B, m, Cout_pad), jnp.float32),
        grid_spec=pltpu.PrefetchScalarGridSpec(
            num_scalar_prefetch=0,
            grid=(B,),
            in_specs=[
                pl.BlockSpec((1, Hp * Wp, Kc), lambda bb: (bb, 0, 0)),
                # full weights / bias resident in VMEM (constant index_map)
                pl.BlockSpec((kh, Kc, Cout_pad), lambda bb: (0, 0, 0)),
                pl.BlockSpec((1, Cout_pad), lambda bb: (0, 0)),
            ],
            out_specs=pl.BlockSpec((1, m, Cout_pad), lambda bb: (bb, 0, 0)),
        ),
        compiler_params=pltpu.CompilerParams(
            dimension_semantics=("parallel",)),
    )(xc, wf, bf)
    # Slice the padded slab to NHWC once, in the wrapper (not in the kernel).
    return out.reshape(B, H, Wp, Cout_pad)[:, :, :W, :Cout]


# ---------------------------------------------------------------------------
# Spectrogram (torchaudio.Spectrogram(power=None, normalized=True, center=False))
# followed by cat([real, imag], dim=1).transpose(-1, -2), returned as NHWC:
# (B, n_frames, n_freq, 2C).
# ---------------------------------------------------------------------------
def spectrogram_features_nhwc(x, n_fft, hop_length, win_length):
    B, C, T = x.shape
    n_frames = 1 + (T - n_fft) // hop_length
    n_freq = n_fft // 2 + 1

    idx = (jnp.arange(n_frames)[:, None] * hop_length
           + jnp.arange(win_length)[None, :])
    frames = x[:, :, idx].reshape(B * C * n_frames, win_length).astype(jnp.float32)

    n = jnp.arange(win_length, dtype=jnp.float32)[:, None]
    f = jnp.arange(n_freq, dtype=jnp.float32)[None, :]
    ang = 2.0 * jnp.pi * n * f / float(n_fft)
    window = 0.5 * (1.0 - jnp.cos(
        2.0 * jnp.pi * jnp.arange(win_length, dtype=jnp.float32) / win_length))
    wnorm = jnp.sqrt(jnp.sum(window ** 2))     # normalized=True -> 'window'
    cos_m = (window[:, None] * jnp.cos(ang)) / wnorm
    sin_m = (-window[:, None] * jnp.sin(ang)) / wnorm
    dft = jnp.concatenate([cos_m, sin_m], axis=1)          # (win, 2*n_freq)

    spec = pallas_stft_matmul(frames, dft).reshape(B, C, n_frames, 2 * n_freq)
    real = jnp.transpose(spec[..., :n_freq], (0, 2, 3, 1))  # (B, T_frames, F, C)
    imag = jnp.transpose(spec[..., n_freq:], (0, 2, 3, 1))
    return jnp.concatenate([real, imag], axis=-1)           # (B, T_frames, F, 2C)


# ---------------------------------------------------------------------------
# Parameter init (deterministic, synthetic).  weight_norm(Conv2d) at init:
# g = ||v|| per output channel, weight = g * v / ||v|| = v.
# ---------------------------------------------------------------------------
def init_weightnorm_conv(key, kh, kw, cin, cout):
    kv, kb = jax.random.split(key)
    v = jax.random.normal(kv, (cout, cin, kh, kw), jnp.float32) * 0.05
    vnorm = jnp.sqrt(jnp.sum(v * v, axis=(1, 2, 3), keepdims=True))
    w_oihw = vnorm * v / vnorm
    b = jax.random.normal(kb, (cout,), jnp.float32) * 0.01
    return jnp.transpose(w_oihw, (2, 3, 1, 0)), b           # OIHW -> HWIO


class STFTDiscriminatorPallas:
    def __init__(self, key, ch=8, channels=2, n_fft=64, hop_length=16,
                 win_length=64, k=(3, 9), d=(1, 2, 4), s=(1, 1)):
        assert s == (1, 1)
        assert win_length == n_fft
        self.n_fft, self.hop, self.win = n_fft, hop_length, win_length
        specs = [
            (2 * channels, ch,      k,            (1, 1)),
            (ch,           ch * 2,  k,            (d[0], 1)),
            (ch * 2,       ch * 4,  k,            (d[1], 1)),
            (ch * 4,       ch * 8,  k,            (d[2], 1)),
            (ch * 8,       ch * 16, (k[0], k[0]), (1, 1)),
        ]
        keys = jax.random.split(key, len(specs) + 1)
        self.blocks = []
        for kk, (cin, cout, ksz, dil) in zip(keys[:-1], specs):
            w, b = init_weightnorm_conv(kk, ksz[0], ksz[1], cin, cout)
            self.blocks.append((w, b, dil))
        w, b = init_weightnorm_conv(keys[-1], k[0], k[0], ch * 16, 1)
        self.conv_out = (w, b)

    def __call__(self, x):
        # x: (B, channels, T) audio
        y = spectrogram_features_nhwc(x, self.n_fft, self.hop, self.win)
        h_nhwc = []
        for w, b, dil in self.blocks:          # stay NHWC; no per-layer transposes
            y = conv2d_pallas(y, w, b, dil, apply_lrelu=True)   # fused lrelu(0.2)
            h_nhwc.append(y)
        w, b = self.conv_out
        y = conv2d_pallas(y, w, b, (1, 1), apply_lrelu=False)
        # torch-layout (NCHW) outputs emitted once, at the end
        h = [jnp.transpose(t, (0, 3, 1, 2)) for t in h_nhwc]
        return jnp.transpose(y, (0, 3, 1, 2)), h


if __name__ == "__main__":
    key = jax.random.PRNGKey(0)
    kparam, kx = jax.random.split(key)
    # Small config consistent with the module (constructor-parameterized):
    # ch=8, channels=2, n_fft=64, hop=16, win=64; T=176 -> 8 frames, 33 freq bins.
    model = STFTDiscriminatorPallas(kparam, ch=8, channels=2,
                                    n_fft=64, hop_length=16, win_length=64)
    x = jax.random.normal(kx, (2, 2, 176), jnp.float32)
    out, h = model(x)
    out = jax.block_until_ready(out)
    h = jax.block_until_ready(h)
    assert out.shape == (2, 1, 8, 33), out.shape
    assert len(h) == 5
    assert [t.shape for t in h] == [(2, 8, 8, 33), (2, 16, 8, 33), (2, 32, 8, 33),
                                    (2, 64, 8, 33), (2, 128, 8, 33)]
    assert bool(jnp.all(jnp.isfinite(out)))
    assert all(bool(jnp.all(jnp.isfinite(t))) for t in h)
    print("KERNEL_OK")
</pallas_src>

<mosaic_0001>
module attributes {stable_mosaic.version = 11 : i64} {
  func.func @_stft_matmul_kernel(%arg0: i32, %arg1: memref<16x64xf32, #tpu.memory_space<vmem>>, %arg2: memref<64x128xf32, #tpu.memory_space<vmem>>, %arg3: memref<16x128xf32, #tpu.memory_space<vmem>>) attributes {dimension_semantics = [#tpu.dimension_semantics<parallel>], iteration_bounds = array<i64: 2>, scalar_prefetch = 0 : i64, scratch_operands = 0 : i64, tpu.core_type = #tpu.core_type<tc>, window_params = [{transform_indices = @transform_0, window_bounds = array<i64: 16, 64>}, {pipeline_mode = #tpu.pipeline_mode<synchronous>, transform_indices = @transform_1, window_bounds = array<i64: 64, 128>}, {transform_indices = @transform_2, window_bounds = array<i64: 16, 128>}]} {
    %c0 = arith.constant 0 : index
    %c0_0 = arith.constant 0 : index
    %0 = vector.load %arg1[%c0, %c0_0] : memref<16x64xf32, #tpu.memory_space<vmem>>, vector<16x64xf32>
    %c0_1 = arith.constant 0 : index
    %c0_2 = arith.constant 0 : index
    %1 = vector.load %arg2[%c0_1, %c0_2] : memref<64x128xf32, #tpu.memory_space<vmem>>, vector<64x128xf32>
    %cst = arith.constant dense<0.000000e+00> : vector<16x128xf32>
    %2 = tpu.matmul %0, %1, %cst {dimension_numbers = #tpu.dot_dimension_numbers<[1], [0], [0], [1], [0, 0, 1, 1], [], []>} : vector<16x64xf32>, vector<64x128xf32>, vector<16x128xf32> -> vector<16x128xf32>
    %c0_3 = arith.constant 0 : index
    %c0_4 = arith.constant 0 : index
    %3 = vector.load %arg3[%c0_3, %c0_4] : memref<16x128xf32, #tpu.memory_space<vmem>>, vector<16x128xf32>
    tpu.vector_store %arg3[%c0_3, %c0_4], %2 {strides = array<i32>} : memref<16x128xf32, #tpu.memory_space<vmem>>, vector<16x128xf32>,
    return
  }
  func.func @transform_0(%arg0: i32) -> (i32, i32) {
    %c0_i32 = arith.constant 0 : i32
    %c0_i32_0 = arith.constant 0 : i32
    return %arg0, %c0_i32 : i32, i32
  }
  func.func @transform_1(%arg0: i32) -> (i32, i32) {
    %c0_i32 = arith.constant 0 : i32
    %c0_i32_0 = arith.constant 0 : i32
    %c0_i32_1 = arith.constant 0 : i32
    return %c0_i32, %c0_i32_0 : i32, i32
  }
  func.func @transform_2(%arg0: i32) -> (i32, i32) {
    %c0_i32 = arith.constant 0 : i32
    %c0_i32_0 = arith.constant 0 : i32
    return %arg0, %c0_i32 : i32, i32
  }
}

</mosaic_0001>

<bundles_post_ra>
// kernel: tpu_custom_call.1
= control target key start
LH: loop header
LB: loop body
LE: loop exit
PB: predicated region body
PF: predicated region fallthrough
CT: control target
= control target key end

     0   :  { %7 = vsyncpa [#allocation3], 0  ;;  %s861_s0 = inlined_call_operand.hbm [shape: f32[32,64], index: 0, kind: input, shape index: {}]   ;;  %s862_s1 = inlined_call_operand.hbm [shape: f32[64,128], index: 1, kind: input, shape index: {}]   ;;  %s863_s2 = inlined_call_operand.hbm [shape: f32[32,128], index: 2, kind: output, shape index: {}]  }
   0x1   :  { %9 = vsyncpa [#allocation3 + $0x1], 0 }
   0x2   :  { %10 = vsyncpa [#allocation6], 0 }
   0x3   :  { %11 = vsyncpa [#allocation4], 0 }
   0x4   :  { %13 = vsyncpa [#allocation4 + $0x1], 0  ;;  %s648_s9 = smov 0   ;;  %s650_s10 = smov 0  }
   0x5   :  { %s652_s11 = smov 0   ;;  %s654_s12 = smov 0  }
   0x6 LB: > { %s669_s13 = sadd.s32 4294967295, %s624_s12   ;;  %s370_s14 = sadd.s32 4294967294, %s624_s12   ;;  %s624_s12 = sphi %s654_s12, %s883_s12   ;;  %s620_s11 = sphi %s652_s11, %s882_s11   ;;  %s616_s10 = sphi %s650_s10, %s881_s10   ;;  %s612_s9 = sphi %s648_s9, %s880_s9  }
   0x7   : > { %p39_p0 = scmp.ne.s32.totalorder %s616_s10, %s612_s9  ;;  %p864_p1 = scmp.eq.s32.totalorder %s669_s13, 0 }
   0x8   : > { %p90_p3 = scmp.eq.s32.totalorder %s370_s14, 1  ;;  %p371_p5 = scmp.ge.s32.totalorder %s624_s12, 1 }
   0x9   : > { %p678_p4 = por %p864_p1, %p39_p0  ;;  %p97_p7 = scmp.lt.s32.totalorder %s624_s12, 3 }
   0xa   : > { %p683_p6 = por %p90_p3, %p39_p0  ;;  %s626_s18 = smov [#allocation5]  }
   0xb   : > { %s867_s15 = scalar_select %p678_p4, 1, 0 }
   0xc   : > { %s868_s16 = scalar_select %p683_p6, 1, 0 }
   0xd   : > { %p688_p8 = pnand %p371_p5, %p97_p7  ;;  %s109_s19 = sshll.u32 %s626_s18, 4  ;;  %s692_s19 = int_to_ptr.vmem [resolvable:$true] %s109_s19 }
   0xe   : > { %s704_s21 = sadd.s32 1, %s624_s12   ;;  %s26_s22 = sadd.s32 1, %s620_s11 }
   0xf   : > { %s869_s17 = scalar_select %p688_p8, 1, 0 }
  0x10   : > { %p443_p9 = pneg %p688_p8  ;;  %s23_s23 = ssub.s32 %s624_s12, %s704_s21 }
  0x11   : > { %s496_s26 = scalar_lea.hbm %s862_s1, 1024 }
  0x12   : > { %p699_p11 = pnand %p443_p9, %p864_p1  ;;  %p497_p12 = scmp.ne.s32.totalorder %s862_s1, %s496_s26 }
  0x13   : > { %p503_p5 = scmp.lt.u32.totalorder %s496_s26, %s862_s1 }
  0x14   : > { %p498_p13 = pneg %p699_p11 }
  0x16   : > { %p499_p0 = pnand %p498_p13, %p497_p12 }
  0x18   : > { %p500_p3 = pneg %p499_p0 }
  0x1a   : > { %p505_p7 = pnand %p503_p5, %p500_p3 }
  0x1c   : > { %508 = shalt.err (!%p505_p7)
}
  0x1d   : > { %s509_s3 = scalar_lea.vmem %s692_s19, 1024  ;;  %p517_p2 = scmp.lt.s32.totalorder %s692_s19, %s692_s19 }
  0x1e   : > { %p510_p9 = scmp.ne.s32.totalorder %s692_s19, %s509_s3  ;;  %p518_p6 = scmp.lt.s32.totalorder %s509_s3, %s509_s3 }
  0x20   : > { %p512_p10 = pnand %p510_p9, %p498_p13  ;;  %p519_p4 = por %p518_p6, %p517_p2 }
  0x22   : > { %p513_p1 = pneg %p512_p10 }
  0x24   : > { %p520_p8 = pnand %p519_p4, %p513_p1 }
  0x26   : > { %523 = shalt.err (!%p520_p8)
}
  0x27   : > { %s627_s4 = smov 128   ;;  %s628_s5 = smov 8  }
  0x28   : > { %446 = dma.hbm_to_vmem [thread:$0]  (!%p699_p11), %s862_s1, 1024, %s692_s19, [#allocation6], %s627_s4, %s627_s4, %s628_s5  }
  0x29   : > { %p24_p1 = scmp.eq.s32.totalorder %s23_s23, 0  ;;  %p33_p2 = scmp.ne.s32.totalorder %s620_s11, %s616_s10 }
  0x2a   : > { %p34_p4 = scmp.eq.s32.totalorder %s624_s12, 0  ;;  %p456_p6 = scmp.lt.s32.totalorder %s624_s12, 2 }
  0x2b   : > { %s738_s8 = scalar_select %p24_p1, %s620_s11, %s26_s22  }
  0x2c   : > { %p35_p8 = por %p34_p4, %p33_p2  ;;  %p871_p10 = scmp.eq.s32.totalorder %s669_s13, 1 }
  0x2d   : > { %s123_s18 = sand.u32 1, %s620_s11   ;;  %s388_s20 = sshll.u32 %s624_s12, 8 }
  0x2e   : > { %p742_p12 = por %p871_p10, %p33_p2  ;;  %s374_s24 = sshll.u32 %s123_s18, 4 }
  0x2f   : > { %s751_s27 = scalar_lea.hbm %s861_s0, %s388_s20  ;;  %s127_s19 = scalar_lea.vmem [#allocation2], %s374_s24 }
  0x30   : > { %s134_s22 = sshll.u32 %s127_s19, 4  ;;  %p753_p11 = pnand %p456_p6, %p35_p8  ;;  %s757_s22 = int_to_ptr.vmem [resolvable:$true] %s134_s22 }
  0x31   : > { %s759_s28 = scalar_lea.sflag [#allocation3], %s123_s18  ;;  %s524_s29 = scalar_lea.hbm %s751_s27, 256 }
  0x32   : > { %p525_p13 = scmp.ne.s32.totalorder %s751_s27, %s524_s29  ;;  %p526_p0 = pneg %p753_p11 }
  0x33   : > { %s529_s6 = scalar_lea.hbm %s861_s0, 512  ;;  %p530_p7 = scmp.lt.u32.totalorder %s751_s27, %s861_s0 }
  0x34   : > { %p527_p3 = pnand %p526_p0, %p525_p13  ;;  %p531_p9 = scmp.lt.u32.totalorder %s529_s6, %s524_s29 }
  0x35   : > { %p533_p2 = scmp.lt.u32.totalorder %s524_s29, %s751_s27 }
  0x36   : > { %p528_p5 = pneg %p527_p3  ;;  %p532_p1 = por %p531_p9, %p530_p7 }
  0x38   : > { %p534_p4 = por %p533_p2, %p532_p1 }
  0x3a   : > { %p535_p6 = pnand %p534_p4, %p528_p5 }
  0x3c   : > { %538 = shalt.err (!%p535_p6)
}
  0x3d   : > { %s539_s18 = scalar_lea.vmem %s757_s22, 256  ;;  %s629_s24 = smov [#allocation2]  }
  0x3e   : > { %p540_p8 = scmp.ne.s32.totalorder %s757_s22, %s539_s18  ;;  %s544_s25 = sshll.u32 %s629_s24, 4  ;;  %s545_s25 = int_to_ptr.vmem [resolvable:$false] %s544_s25 }
  0x3f   : > { %s546_s26 = scalar_lea.vmem %s545_s25, 512  ;;  %p547_p3 = scmp.lt.s32.totalorder %s757_s22, %s545_s25 }
  0x40   : > { %p542_p10 = pnand %p540_p8, %p526_p0  ;;  %p548_p7 = scmp.lt.s32.totalorder %s546_s26, %s539_s18 }
  0x42   : > { %p543_p13 = pneg %p542_p10  ;;  %p549_p9 = por %p548_p7, %p547_p3 }
  0x44   : > { %p550_p1 = pnand %p549_p9, %p543_p13 }
  0x46   : > { %553 = shalt.err (!%p550_p1)
}
  0x47   : > { %450 = dma.hbm_to_vmem [thread:$0]  (!%p753_p11), %s751_s27, 256, %s757_s22, %s759_s28, %s627_s4, %s627_s4, %s628_s5  }
  0x48   : > { %p874_p0 = scmp.ne.s32.totalorder %s869_s17, 0 }
  0x49   : > { %s793_s19 = sand.u32 (!%p874_p0), 1, %s616_s10   ;;  %p875_p5 = scmp.ne.s32.totalorder (!%p874_p0), %s867_s15, 0 }
  0x4a   : > { %146 = sbr.rel (%p874_p0) target bundleno = 332 (0x14c), region = 28  ;;  %s378_s29 = sshll.u32 (!%p874_p0), %s793_s19, 4 }
  0x4b   : > { %s149_s30 = scalar_lea.sflag (!%p874_p0), [#allocation3], %s793_s19  ;;  %s152_s23 = scalar_lea.vmem (!%p874_p0), [#allocation2], %s378_s29 }
  0x51   : > { %599 = dma.done.wait (%p875_p5), %s149_s30, 256  }
  0x52   : > { %601 = vsyncadd (%p875_p5), %s149_s30, 4294967040  ;;  %p876_p11 = scmp.eq.s32.totalorder %s669_s13, 0 }
  0x54   : > { %603 = dma.done.wait (%p876_p11), [#allocation6], 1024   ;;  %p877_p2 = pmov %p876_p11 }
  0x55   : > { %v181_v0 = vld [vmem:[#allocation5] sm:$0xff]  ;;  %v182_v1 = vld [vmem:[#allocation5 + $0x8] sm:$0xff]  ;;  %v183_v2 = vld [vmem:[#allocation5 + $0x10] sm:$0xff]  ;;  %vm189_vm0 = vcmask 523264   ;;  %s176_s15 = scalar_lea.vmem [#allocation7], %s378_s29  ;;  %s389_s4 = sshll.u32 %s669_s13, 8 }
  0x56   : > { %605 = vsyncadd (%p877_p2), [#allocation6], 4294966272  ;;  %v419_v3 = vpack.c.bf16 %v182_v1, %v181_v0  ;;  %v184_v4 = vld [vmem:[#allocation5 + $0x18] sm:$0xff]  ;;  %v185_v6 = vld [vmem:[#allocation5 + $0x20] sm:$0xff]  ;;  %s287_s17 = sshll.u32 %s176_s15, 4  ;;  %s817_s22 = scalar_lea.hbm %s863_s2, %s389_s4  ;;  %s812_s17 = int_to_ptr.vmem [resolvable:$true] %s287_s17 }
  0x57   : > { %v423_v5 = vpack.c.bf16 %v184_v4, %v183_v2  ;;  %v186_v7 = vld [vmem:[#allocation5 + $0x28] sm:$0xff]  ;;  %v179_v8 = vld [vmem:[%s152_s23] sm:$0xff]  ;;  %v188_v11 = vld [vmem:[#allocation5 + $0x38] sm:$0xff]  ;;  %s274_s28 = scalar_lea.sflag [#allocation4], %s793_s19  ;;  %s554_s3 = scalar_lea.vmem %s812_s17, 256 }
  0x58   : > { %420 = vmatprep.subr.bf16.mxu0 %v419_v3  ;;  %416 = vmatprep.mubr.msk.f32.mxu0 %vm189_vm0, %v179_v8  ;;  %v427_v9 = vpack.c.bf16 %v186_v7, %v185_v6  ;;  %v187_v10 = vld [vmem:[#allocation5 + $0x30] sm:$0xff]  ;;  %v180_v13 = vld [vmem:[%s152_s23 + $0x8] sm:$0xff]  ;;  %p555_p4 = scmp.ne.s32.totalorder %s812_s17, %s554_s3  ;;  %s630_s13 = smov [#allocation7]  }
  0x59   : > { %422 = vmatpush3.bf16.msra.mxu0 %v419_v3  ;;  %v431_v12 = vpack.c.bf16 %v188_v11, %v187_v10  ;;  %s558_s6 = sshll.u32 %s630_s13, 4  ;;  %s559_s6 = int_to_ptr.vmem [resolvable:$false] %s558_s6 }
  0x5a   : > { %424 = vmatprep.subr.bf16.mxu0 %v423_v5  ;;  %p556_p6 = pnand %p555_p4, %p742_p12  ;;  %s560_s7 = scalar_lea.vmem %s559_s6, 512 }
  0x5b   : > { %p561_p10 = scmp.lt.s32.totalorder %s812_s17, %s559_s6  ;;  %p562_p13 = scmp.lt.s32.totalorder %s560_s7, %s554_s3 }
  0x5c   : > { %p557_p8 = pneg %p556_p6 }
  0x5d   : > { %426 = vmatpush3.bf16.msra.mxu0 %v423_v5  ;;  %p563_p3 = por %p562_p13, %p561_p10 }
  0x5e   : > { %428 = vmatprep.subr.bf16.mxu0 %v427_v9 }
  0x5f   : > { %p564_p7 = pnand %p563_p3, %p557_p8 }
  0x61   : > { %430 = vmatpush3.bf16.msra.mxu0 %v427_v9 }
  0x62   : > { %432 = vmatprep.subr.bf16.mxu0 %v431_v12 }
  0x65   : > { %434 = vmatpush3.bf16.msra.mxu0 %v431_v12 }
  0x68   : > { %417 = vmatmul.mubr.msk.f32.vlgmr.msra.gmra.mrb[0].mxu0 %vm189_vm0, %v180_v13 }
 0x13b   : > { %v418_v14 = vpop.f32.mrb[0].mxu0 }
 0x13c   : > { %272 = vst [vmem:[%s176_s15 + $0x8] sm:$0xff] %v418_v14  ;;  %v262_v15 = vpop.f32.mrb[1].mxu0 }
 0x13d   : > { %271 = vst [vmem:[%s176_s15] sm:$0xff] %v262_v15 }
 0x13e   : > { %567 = shalt.err (!%p564_p7)
}
 0x13f   : > { %s568_s20 = scalar_lea.hbm %s817_s22, 256  ;;  %s572_s25 = scalar_lea.hbm %s863_s2, 512 }
 0x140   : > { %p569_p9 = scmp.ne.s32.totalorder %s817_s22, %s568_s20  ;;  %p573_p5 = scmp.lt.u32.totalorder %s817_s22, %s863_s2 }
 0x141   : > { %p574_p11 = scmp.lt.u32.totalorder %s572_s25, %s568_s20  ;;  %p576_p4 = scmp.lt.u32.totalorder %s568_s20, %s817_s22 }
 0x142   : > { %p570_p1 = pnand %p569_p9, %p742_p12 }
 0x143   : > { %p575_p2 = por %p574_p11, %p573_p5 }
 0x144   : > { %p571_p0 = pneg %p570_p1 }
 0x145   : > { %p577_p6 = por %p576_p4, %p575_p2 }
 0x147   : > { %p578_p8 = pnand %p577_p6, %p571_p0 }
 0x149   : > { %581 = shalt.err (!%p578_p8)
}
 0x14a   : > { %s631_s30 = smov 128   ;;  %s632_s23 = smov 8  }
 0x14b   : > { %441 = dma.vmem_to_hbm [thread:$0]  (%p742_p12), %s812_s17, 256, %s817_s22, %s274_s28, %s631_s30, %s631_s30, %s632_s23  }
 0x14c PF: > { %s302_s15 = sand.u32 1, %s612_s9   ;;  %p878_p10 = scmp.ne.s32.totalorder %s868_s16, 0 }
 0x14d   : > { %p879_p13 = scmp.ge.s32.totalorder %s624_s12, 2  ;;  %s303_s4 = scalar_lea.sflag [#allocation4], %s302_s15 }
 0x14f   : > { %p452_p3 = pnand %p879_p13, %p878_p10 }
 0x151   : > { %607 = dma.done.wait (!%p452_p3), %s303_s4, 256  }
 0x152   : > { %609 = vsyncadd (!%p452_p3), %s303_s4, 4294967040  ;;  %p16_p7 = scmp.ge.s32.totalorder %s704_s21, 4   ;;  %s880_s9 = smov %s616_s10 }
 0x153   : > { %s881_s10 = smov %s620_s11  ;;  %s882_s11 = smov %s738_s8 }
 0x154   : > { %s883_s12 = smov %s704_s21  ;;  %18 = sbr.rel (!%p16_p7) target bundleno = 6 (0x6), region = 77 }
 0x15b   :  { %308 = vsyncpa [#allocation3], 1 }
 0x15c   :  { %310 = vsyncpa [#allocation3 + $0x1], 1 }
 0x15d   :  { %311 = vsyncpa [#allocation6], 1 }
 0x15e   :  { %312 = vsyncpa [#allocation4], 1 }
 0x15f   :  { %314 = vsyncpa [#allocation4 + $0x1], 1 }

</bundles_post_ra>
